<compile_context>
chip_gen: v7x
topology: tpu7x:2x2x1
jax: 0.10.0
libtpu: 0.0.40
codegen_flags: <defaults>
</compile_context>

<pallas_src>
import math
import functools

import jax
import jax.numpy as jnp
from jax.experimental import pallas as pl
from jax.experimental.pallas import tpu as pltpu


_LANES = 128
_SUBLANES = 8
# Total double-buffered VMEM budget for one grid step's in+out tiles.
# 8 MiB stays comfortably inside scoped-VMEM defaults on v5e/v6e/v7x.
_DEFAULT_VMEM_BUDGET = 8 * 1024 * 1024


def _round_up(x, m):
    return ((x + m - 1) // m) * m


def _cdiv(a, b):
    return -(-a // b)


# --------------------------------------------------------------------------
# Fast path: 128 % dim == 0  ->  lane-dense packed output (rows, 128)
# --------------------------------------------------------------------------
def _packed_kernel(t_ref, m_ref, p_ref, out_ref, *, rows_per_vreg_row,
                   exact_trig):
    # t_ref:   (tp, R)   f32 — R consecutive timesteps per packed output row
    # m_ref:   (R, 128)  f32 — row r: freq[(l % dim) % half_dim] on lanes with
    #                          l // dim == r, zero elsewhere (resident in VMEM)
    # p_ref:   (1, 128)  f32 — 0 on sin lanes, pi/2 on cos lanes (resident)
    # out_ref: (tp, 128)     — lane-dense packed embedding tile
    R = rows_per_vreg_row
    # Expand time along lanes and multiply by the frequency pattern in one
    # unrolled broadcast-MAC: for each lane exactly one term is non-zero, so
    # args is bit-exact t*freq.
    args = t_ref[:, 0:1] * m_ref[0:1, :]
    for r in range(1, R):
        args = args + t_ref[:, r:r + 1] * m_ref[r:r + 1, :]
    if exact_trig:
        # Bit-matching path: compute both sin and cos, lane-select.
        out = jnp.where(p_ref[...] == 0.0, jnp.sin(args), jnp.cos(args))
    else:
        # Shared path: cos(x) = sin(x + pi/2); one transcendental per element.
        out = jnp.sin(args + p_ref[...])
    out_ref[...] = out.astype(out_ref.dtype)


# --------------------------------------------------------------------------
# Fallback: dim does not divide 128 (e.g. 192, 384) -> two static-slice stores
# TODO(synk): lane-dense repack for these dims too (cos store straddles a lane
# tile when half_dim % 128 != 0).
# --------------------------------------------------------------------------
def _twostore_kernel(t_ref, freq_ref, out_ref, *, half_dim):
    # t_ref: (tn, 1) f32, freq_ref: (1, half_dim) f32, out_ref: (tn, dim)
    args = t_ref[...] * freq_ref[...]
    out_ref[:, :half_dim] = jnp.sin(args).astype(out_ref.dtype)
    out_ref[:, half_dim:] = jnp.cos(args).astype(out_ref.dtype)


def sinusoidal_position_embeddings(time, dim, *, out_dtype=jnp.float32,
                                   exact_trig=False,
                                   vmem_budget_bytes=_DEFAULT_VMEM_BUDGET):
    """JAX/Pallas equivalent of SinusoidalPositionEmbeddings(dim)(time).

    out_dtype=jnp.bfloat16 halves HBM writeback (recommended on v5e when the
    consumer accepts bf16).  exact_trig=True uses true cos instead of the
    sin(x + pi/2) identity (slower; differs only at the argument-ulp level).
    """
    assert dim % 2 == 0 and dim >= 4, "dim must be even and >= 4"
    n = time.shape[0]
    half_dim = dim // 2
    out_itemsize = jnp.dtype(out_dtype).itemsize

    # Frequency table computed once outside the kernel (hoisted off the EUP).
    scale = -math.log(10000.0) / (half_dim - 1)
    freqs = jnp.exp(jnp.arange(half_dim, dtype=jnp.float32) * scale)

    t1 = time.astype(jnp.float32)

    if _LANES % dim == 0:
        # ---------------- lane-dense packed path ----------------
        R = _LANES // dim                     # original rows per packed row
        # Per packed row of VMEM: output row (128*itemsize) + lane-padded time
        # row (128*4 B), each double-buffered.
        per_row = 2 * _LANES * out_itemsize + 2 * _LANES * 4
        tp = max(_SUBLANES,
                 (vmem_budget_bytes // per_row) // _SUBLANES * _SUBLANES)
        tp = min(tp, _round_up(_cdiv(n, R), _SUBLANES))   # don't over-pad tiny N
        rows_per_tile = tp * R
        padded_n = _round_up(n, rows_per_tile)
        n_packed = padded_n // R

        if padded_n != n:
            t1 = jnp.pad(t1, (0, padded_n - n))
        t2 = t1.reshape(n_packed, R)

        # Resident tables: frequency/expansion matrix and phase vector.
        lane = jnp.arange(_LANES)
        col = lane % dim
        fvals = freqs[col % half_dim]                                  # (128,)
        m_tab = jnp.where((lane // dim)[None, :] == jnp.arange(R)[:, None],
                          fvals[None, :], 0.0).astype(jnp.float32)    # (R,128)
        p_tab = jnp.where(col < half_dim, 0.0, math.pi / 2.0)
        p_tab = p_tab.reshape(1, _LANES).astype(jnp.float32)          # (1,128)

        kernel = functools.partial(_packed_kernel, rows_per_vreg_row=R,
                                   exact_trig=exact_trig)
        out = pl.pallas_call(
            kernel,
            out_shape=jax.ShapeDtypeStruct((n_packed, _LANES), out_dtype),
            grid_spec=pltpu.PrefetchScalarGridSpec(
                num_scalar_prefetch=0,
                grid=(n_packed // tp,),
                in_specs=[
                    pl.BlockSpec((tp, R), lambda i: (i, 0)),        # time tile
                    pl.BlockSpec((R, _LANES), lambda i: (0, 0)),    # resident
                    pl.BlockSpec((1, _LANES), lambda i: (0, 0)),    # resident
                ],
                out_specs=pl.BlockSpec((tp, _LANES), lambda i: (i, 0)),
            ),
            # "parallel" is honest (iterations independent) but does NOT split
            # across v7x TensorCores; see CORE_PARALLEL TODO at top of file.
            compiler_params=pltpu.CompilerParams(
                dimension_semantics=("parallel",)),
            cost_estimate=pl.CostEstimate(
                flops=3 * padded_n * dim,
                transcendentals=(2 if exact_trig else 1) * padded_n * dim,
                bytes_accessed=padded_n * dim * out_itemsize + 4 * padded_n),
        )(t2, m_tab, p_tab)
        out = out.reshape(padded_n, dim)      # free row-major repack
    else:
        # ---------------- two-slice-store fallback ----------------
        per_row = 2 * dim * out_itemsize + 2 * _LANES * 4   # out + padded time
        tn = max(_SUBLANES,
                 (vmem_budget_bytes // per_row) // _SUBLANES * _SUBLANES)
        tn = min(tn, _round_up(n, _SUBLANES))
        padded_n = _round_up(n, tn)

        t2 = t1.reshape(n, 1)
        if padded_n != n:
            t2 = jnp.pad(t2, ((0, padded_n - n), (0, 0)))
        freq2 = freqs.reshape(1, half_dim)

        kernel = functools.partial(_twostore_kernel, half_dim=half_dim)
        out = pl.pallas_call(
            kernel,
            out_shape=jax.ShapeDtypeStruct((padded_n, dim), out_dtype),
            grid_spec=pltpu.PrefetchScalarGridSpec(
                num_scalar_prefetch=0,
                grid=(padded_n // tn,),
                in_specs=[
                    pl.BlockSpec((tn, 1), lambda i: (i, 0)),
                    pl.BlockSpec((1, half_dim), lambda i: (0, 0)),
                ],
                out_specs=pl.BlockSpec((tn, dim), lambda i: (i, 0)),
            ),
            compiler_params=pltpu.CompilerParams(
                dimension_semantics=("parallel",)),
            cost_estimate=pl.CostEstimate(
                flops=padded_n * dim,
                transcendentals=padded_n * dim,
                bytes_accessed=padded_n * dim * out_itemsize + 4 * padded_n),
        )(t2, freq2)

    if padded_n != n:
        out = out[:n]
    return out


def _reference(time, dim):
    half_dim = dim // 2
    scale = math.log(10000.0) / (half_dim - 1)
    freqs = jnp.exp(jnp.arange(half_dim, dtype=jnp.float32) * -scale)
    emb = time.astype(jnp.float32)[:, None] * freqs[None, :]
    return jnp.concatenate([jnp.sin(emb), jnp.cos(emb)], axis=-1)


if __name__ == "__main__":
    root = jax.random.PRNGKey(0)
    k1, k2, k3 = jax.random.split(root, 3)

    # Case 1: packed lane-dense path, dim=32 (R=4), ragged N, default phase
    # trick.  Tolerance 1e-4: the sin(x+pi/2) identity deviates from exact cos
    # by at most ~ulp(|t*f|) ~ 3e-5 at |t*f| ~ 1e3.
    DIM = 32
    N = 20
    time = jax.random.uniform(k1, (N,), dtype=jnp.float32) * 1000.0
    out = jax.block_until_ready(sinusoidal_position_embeddings(time, DIM))
    ref = _reference(time, DIM)
    assert out.shape == (N, DIM), out.shape
    assert jnp.allclose(out, ref, atol=1e-4), "mismatch (case 1: packed/phase)"

    # Case 2: packed path, multi-tile grid (tiny VMEM budget forces 4 grid
    # steps), exact_trig=True -> bit-matching sin/cos path.
    N2 = 200
    time2 = jax.random.uniform(k2, (N2,), dtype=jnp.float32) * 1000.0
    out2 = jax.block_until_ready(
        sinusoidal_position_embeddings(time2, DIM, exact_trig=True,
                                       vmem_budget_bytes=32 * 1024))
    ref2 = _reference(time2, DIM)
    assert out2.shape == (N2, DIM), out2.shape
    assert jnp.allclose(out2, ref2, atol=2e-5, rtol=1e-5), \
        "mismatch (case 2: packed/exact multi-tile)"

    # Case 3: fallback two-slice-store path (dim=192 does not divide 128).
    DIM3, N3 = 192, 16
    time3 = jax.random.uniform(k3, (N3,), dtype=jnp.float32) * 1000.0
    out3 = jax.block_until_ready(
        sinusoidal_position_embeddings(time3, DIM3))
    ref3 = _reference(time3, DIM3)
    assert out3.shape == (N3, DIM3), out3.shape
    assert jnp.allclose(out3, ref3, atol=2e-5, rtol=1e-5), \
        "mismatch (case 3: fallback)"

    print("KERNEL_OK")
</pallas_src>

<mosaic_0001>
module attributes {stable_mosaic.version = 11 : i64} {
  func.func @_packed_kernel(%arg0: i32, %arg1: memref<8x4xf32, #tpu.memory_space<vmem>>, %arg2: memref<4x128xf32, #tpu.memory_space<vmem>>, %arg3: memref<1x128xf32, #tpu.memory_space<vmem>>, %arg4: memref<8x128xf32, #tpu.memory_space<vmem>>) attributes {dimension_semantics = [#tpu.dimension_semantics<parallel>], iteration_bounds = array<i64: 1>, scalar_prefetch = 0 : i64, scratch_operands = 0 : i64, tpu.core_type = #tpu.core_type<tc>, window_params = [{transform_indices = @transform_0, window_bounds = array<i64: 8, 4>}, {pipeline_mode = #tpu.pipeline_mode<synchronous>, transform_indices = @transform_1, window_bounds = array<i64: 4, 128>}, {pipeline_mode = #tpu.pipeline_mode<synchronous>, transform_indices = @transform_2, window_bounds = array<i64: 1, 128>}, {transform_indices = @transform_3, window_bounds = array<i64: 8, 128>}]} {
    %c0 = arith.constant 0 : index
    %c0_0 = arith.constant 0 : index
    %0 = vector.load %arg1[%c0, %c0_0] : memref<8x4xf32, #tpu.memory_space<vmem>>, vector<8x1xf32>
    %c0_1 = arith.constant 0 : index
    %c0_2 = arith.constant 0 : index
    %1 = vector.load %arg2[%c0_1, %c0_2] : memref<4x128xf32, #tpu.memory_space<vmem>>, vector<1x128xf32>
    %2 = vector.broadcast %0 : vector<8x1xf32> to vector<8x128xf32>
    %3 = vector.broadcast %1 : vector<1x128xf32> to vector<8x128xf32>
    %4 = arith.mulf %2, %3 : vector<8x128xf32>
    %c0_3 = arith.constant 0 : index
    %c1 = arith.constant 1 : index
    %5 = vector.load %arg1[%c0_3, %c1] : memref<8x4xf32, #tpu.memory_space<vmem>>, vector<8x1xf32>
    %c1_4 = arith.constant 1 : index
    %c0_5 = arith.constant 0 : index
    %6 = vector.load %arg2[%c1_4, %c0_5] : memref<4x128xf32, #tpu.memory_space<vmem>>, vector<1x128xf32>
    %7 = vector.broadcast %5 : vector<8x1xf32> to vector<8x128xf32>
    %8 = vector.broadcast %6 : vector<1x128xf32> to vector<8x128xf32>
    %9 = arith.mulf %7, %8 : vector<8x128xf32>
    %10 = arith.addf %4, %9 : vector<8x128xf32>
    %c0_6 = arith.constant 0 : index
    %c2 = arith.constant 2 : index
    %11 = vector.load %arg1[%c0_6, %c2] : memref<8x4xf32, #tpu.memory_space<vmem>>, vector<8x1xf32>
    %c2_7 = arith.constant 2 : index
    %c0_8 = arith.constant 0 : index
    %12 = vector.load %arg2[%c2_7, %c0_8] : memref<4x128xf32, #tpu.memory_space<vmem>>, vector<1x128xf32>
    %13 = vector.broadcast %11 : vector<8x1xf32> to vector<8x128xf32>
    %14 = vector.broadcast %12 : vector<1x128xf32> to vector<8x128xf32>
    %15 = arith.mulf %13, %14 : vector<8x128xf32>
    %16 = arith.addf %10, %15 : vector<8x128xf32>
    %c0_9 = arith.constant 0 : index
    %c3 = arith.constant 3 : index
    %17 = vector.load %arg1[%c0_9, %c3] : memref<8x4xf32, #tpu.memory_space<vmem>>, vector<8x1xf32>
    %c3_10 = arith.constant 3 : index
    %c0_11 = arith.constant 0 : index
    %18 = vector.load %arg2[%c3_10, %c0_11] : memref<4x128xf32, #tpu.memory_space<vmem>>, vector<1x128xf32>
    %19 = vector.broadcast %17 : vector<8x1xf32> to vector<8x128xf32>
    %20 = vector.broadcast %18 : vector<1x128xf32> to vector<8x128xf32>
    %21 = arith.mulf %19, %20 : vector<8x128xf32>
    %22 = arith.addf %16, %21 : vector<8x128xf32>
    %c0_12 = arith.constant 0 : index
    %c0_13 = arith.constant 0 : index
    %23 = vector.load %arg3[%c0_12, %c0_13] : memref<1x128xf32, #tpu.memory_space<vmem>>, vector<1x128xf32>
    %24 = vector.broadcast %23 : vector<1x128xf32> to vector<8x128xf32>
    %25 = arith.addf %22, %24 : vector<8x128xf32>
    %26 = math.sin %25 : vector<8x128xf32>
    %c0_14 = arith.constant 0 : index
    %c0_15 = arith.constant 0 : index
    %27 = vector.load %arg4[%c0_14, %c0_15] : memref<8x128xf32, #tpu.memory_space<vmem>>, vector<8x128xf32>
    tpu.vector_store %arg4[%c0_14, %c0_15], %26 {strides = array<i32>} : memref<8x128xf32, #tpu.memory_space<vmem>>, vector<8x128xf32>,
    return
  }
  func.func @transform_0(%arg0: i32) -> (i32, i32) {
    %c0_i32 = arith.constant 0 : i32
    %c0_i32_0 = arith.constant 0 : i32
    return %arg0, %c0_i32 : i32, i32
  }
  func.func @transform_1(%arg0: i32) -> (i32, i32) {
    %c0_i32 = arith.constant 0 : i32
    %c0_i32_0 = arith.constant 0 : i32
    %c0_i32_1 = arith.constant 0 : i32
    return %c0_i32, %c0_i32_0 : i32, i32
  }
  func.func @transform_2(%arg0: i32) -> (i32, i32) {
    %c0_i32 = arith.constant 0 : i32
    %c0_i32_0 = arith.constant 0 : i32
    %c0_i32_1 = arith.constant 0 : i32
    return %c0_i32, %c0_i32_0 : i32, i32
  }
  func.func @transform_3(%arg0: i32) -> (i32, i32) {
    %c0_i32 = arith.constant 0 : i32
    %c0_i32_0 = arith.constant 0 : i32
    return %arg0, %c0_i32 : i32, i32
  }
}

</mosaic_0001>

<bundles_post_ra>
// kernel: tpu_custom_call.1
= control target key start
LH: loop header
LB: loop body
LE: loop exit
PB: predicated region body
PF: predicated region fallthrough
CT: control target
= control target key end

     0   :  { %v244_v1 = vmov 0   ;;  %v245_v2 = vmov 2   ;;  %s326_s0 = inlined_call_operand.vmem [shape: f32[8,4], index: 0, kind: input, shape index: {}]   ;;  %s327_s1 = inlined_call_operand.vmem [shape: f32[4,128], index: 1, kind: input, shape index: {}]   ;;  %s328_s2 = inlined_call_operand.vmem [shape: f32[1,128], index: 2, kind: input, shape index: {}]   ;;  %s329_s3 = inlined_call_operand.hbm [shape: f32[8,128], index: 3, kind: output, shape index: {}]  }
   0x1   :  { %v15_v0 = vld [vmem:[%s326_s0] sm:$0xff]  ;;  %211 = vset.pattern.permute.xlu0 %v244_v1  ;;  %213 = vset.pattern.permute.xlu1 %v245_v2 }
   0x2   :  { %8 = vsyncpa [#allocation3], 0  ;;  %19 = vperm.xlu0 %211, %v15_v0   ;;  %40 = vperm.xlu1 %213, %v15_v0   ;;  %v246_v3 = vmov 1   ;;  %v247_v4 = vmov 3   ;;  %v187_v7 = vld [vmem:[%s327_s1] ss:$0 sm:$0xff] }
   0x3   :  { %v188_v8 = vld [vmem:[%s327_s1 + $0x1] ss:$0 sm:$0xff]  ;;  %v189_v9 = vld [vmem:[%s327_s1 + $0x2] ss:$0 sm:$0xff]  ;;  %v190_v11 = vld [vmem:[%s327_s1 + $0x3] ss:$0 sm:$0xff] }
   0x4   :  { %v191_v19 = vld [vmem:[%s328_s2] ss:$0 sm:$0xff]  ;;  %v248_v32 = vmov 683565275   ;;  %v249_v34 = vmov 2475754826  }
   0x5   :  { %v250_v37 = vmov 2131351028   ;;  %v251_v40 = vmov 2102212464   ;;  %v252_v43 = vmov 920167782  }
   0x6   :  { %212 = vset.pattern.permute.xlu0 %v246_v3  ;;  %214 = vset.pattern.permute.xlu1 %v247_v4  ;;  %v253_v46 = vmov 1326507024   ;;  %s254_s1 = smov [#allocation2]  }
   0x7   :  { %29 = vperm.xlu0 %212, %v15_v0   ;;  %51 = vperm.xlu1 %214, %v15_v0   ;;  %s179_s2 = sshll.u32 %s254_s1, 4  ;;  %s180_s2 = int_to_ptr.vmem [resolvable:$true] %s179_s2 }
   0x8   :  { %s220_s23 = scalar_lea.vmem %s180_s2, 128  ;;  %p225_p1 = scmp.lt.s32.totalorder %s180_s2, %s180_s2 }
   0x9   :  { %p221_p0 = scmp.ne.s32.totalorder %s180_s2, %s220_s23  ;;  %p226_p2 = scmp.lt.s32.totalorder %s220_s23, %s220_s23 }
   0xb   :  { %215 = vset.pattern.permute.xlu0 %v247_v4  ;;  %p227_p3 = por %p226_p2, %p225_p1 }
   0xd   :  { %p228_p4 = pnand %p227_p3, %p221_p0 }
  0x81   :  { %v20_v5 = vpop.permute.xlu0 %19  ;;  %v41_v6 = vpop.permute.xlu1 %40 }
  0x82   :  { %v26_v13 = vmul.f32 %v187_v7, %v20_v5  ;;  %v47_v15 = vmul.f32 %v189_v9, %v41_v6 }
  0x86   :  { %v30_v10 = vpop.permute.xlu0 %29  ;;  %v52_v12 = vpop.permute.xlu1 %51 }
  0x87   :  { %v36_v14 = vmul.f32 %v188_v8, %v30_v10  ;;  %v58_v17 = vmul.f32 %v190_v11, %v52_v12 }
  0x89   :  { %v37_v16 = vadd.f32 %v36_v14, %v26_v13 }
  0x8b   :  { %v48_v18 = vadd.f32 %v47_v15, %v37_v16 }
  0x8d   :  { %v59_v20 = vadd.f32 %v58_v17, %v48_v18 }
  0x8f   :  { %v293_v21 = vadd.f32 %v191_v19, %v59_v20 }
  0x91   :  { %v71_v22 = vand.u32 2139095040, %v293_v21  ;;  %v68_v26 = vand.u32 2147483647, %v293_v21  ;;  %vm70_vm7 = vcmp.lt.s32.totalorder %v293_v21, 0  ;;  %vm160_vm12 = vweird.f32 %v293_v21 }
  0x93   :  { %v72_v23 = vshrl.u32 %v71_v22, 23  ;;  %v75_v30 = vand.u32 8388607, %v68_v26  ;;  %vm69_vm8 = vcmp.le.f32.partialorder %v68_v26, 0.7853982 }
  0x95   :  { %v192_v24 = vadd.s32 4294967169, %v72_v23  ;;  %v76_v48 = vor.u32 8388608, %v75_v30 }
  0x97   :  { %v78_v25 = vadd.s32 1, %v192_v24  ;;  %v116_v62 = vshll.u32 %v76_v48, 8 }
  0x99   :  { %vm79_vm0 = vcmp.gt.s32.totalorder %v78_v25, 0 }
  0x9a   :  { %v80_v27 = vsel %vm79_vm0, %v78_v25, 0 }
  0x9b   :  { %v82_v28 = vand.u32 31, %v80_v27  ;;  %v81_v31 = vshrl.u32 %v80_v27, 5 }
  0x9d   :  { %v83_v29 = vsub.s32 32, %v82_v28  ;;  %v85_v33 = vshll.u32 %v248_v32, %v82_v28  ;;  %v88_v35 = vshll.u32 %v249_v34, %v82_v28  ;;  %v91_v39 = vshll.u32 %v250_v37, %v82_v28 }
  0x9e   :  { %v94_v42 = vshll.u32 %v251_v40, %v82_v28  ;;  %v97_v45 = vshll.u32 %v252_v43, %v82_v28  ;;  %vm100_vm1 = vcmp.lt.s32.totalorder %v81_v31, 1  ;;  %vm103_vm2 = vcmp.lt.s32.totalorder %v81_v31, 4 }
  0x9f   :  { %v86_v36 = vshrl.u32 %v249_v34, %v83_v29  ;;  %v89_v38 = vshrl.u32 %v250_v37, %v83_v29  ;;  %v92_v41 = vshrl.u32 %v251_v40, %v83_v29  ;;  %v95_v44 = vshrl.u32 %v252_v43, %v83_v29 }
  0xa0   :  { %v98_v47 = vshrl.u32 %v253_v46, %v83_v29  ;;  %v84_v57 = vshrl.u32 %v248_v32, %v83_v29  ;;  %vm102_vm3 = vcmp.lt.s32.totalorder %v81_v31, 3  ;;  %vm101_vm4 = vcmp.lt.s32.totalorder %v81_v31, 2 }
  0xa1   :  { %v87_v49 = vor.u32 %v86_v36, %v85_v33  ;;  %v90_v50 = vor.u32 %v89_v38, %v88_v35  ;;  %v93_v51 = vor.u32 %v92_v41, %v91_v39  ;;  %v96_v52 = vor.u32 %v95_v44, %v94_v42 }
  0xa2   :  { %v99_v53 = vor.u32 %v98_v47, %v97_v45 }
  0xa3   :  { %v105_v54 = vsel %vm103_vm2, %v93_v51, 2102212464  ;;  %v108_v55 = vsel %vm100_vm1, %v87_v49, %v90_v50  ;;  %v112_v56 = vsel %vm100_vm1, %v90_v50, %v93_v51  ;;  %v109_v58 = vsel %vm103_vm2, %v96_v52, 920167782 }
  0xa4   :  { %v113_v59 = vsel %vm103_vm2, %v99_v53, 1326507024  ;;  %v110_v60 = vsel %vm102_vm3, %v93_v51, %v109_v58  ;;  %v104_v63 = vsel %vm100_vm1, %v84_v57, %v87_v49  ;;  %v106_v0 = vsel %vm102_vm3, %v90_v50, %v105_v54 }
  0xa5   :  { %v114_v61 = vsel %vm102_vm3, %v96_v52, %v113_v59  ;;  %v111_v1 = vsel %vm101_vm4, %v108_v55, %v110_v60  ;;  %v107_v7 = vsel %vm101_vm4, %v104_v63, %v106_v0 }
  0xa6   :  { %v115_v2 = vsel %vm101_vm4, %v112_v56, %v114_v61  ;;  %v302_v5 = vmul.u32.u64.low %v116_v62, %v111_v1  ;;  %v303_v6 = vmul.u32.u64.high %v116_v62, %v111_v1, %v302_v5  ;;  %v123_v9 = vmul.u32 %v116_v62, %v107_v7 }
  0xa7   :  { %v299_v3 = vmul.u32.u64.low %v116_v62, %v115_v2  ;;  %v300_v4 = vmul.u32.u64.high %v116_v62, %v115_v2, %v299_v3 }
  0xa8   :  { %v126_v8 = vadd.s32 1, %v303_v6 }
  0xa9   :  { %vm125_vm5 = vc.u32 %v300_v4, %v302_v5  ;;  %v124_v22 = vadd.s32 %v302_v5, %v300_v4 }
  0xaa   :  { %v127_v10 = vsel %vm125_vm5, %v126_v8, %v303_v6 }
  0xab   :  { %v128_v11 = vadd.s32 %v127_v10, %v123_v9 }
  0xad   :  { %v129_v12 = vadd.s32 536870912, %v128_v11 }
  0xaf   :  { %v130_v13 = vshrl.u32 %v129_v12, 30 }
  0xb1   :  { %v131_v14 = vshll.u32 %v130_v13, 30  ;;  %v154_v35 = vsub.s32 4, %v130_v13 }
  0xb3   :  { %v132_v15 = vsub.s32 %v128_v11, %v131_v14  ;;  %v155_v38 = vsel %vm70_vm7, %v154_v35, %v130_v13 }
  0xb4   :  { %v157_v40 = vsel %vm69_vm8, 0, %v155_v38 }
  0xb5   :  { %v134_v16 = vsub.s32 0, %v132_v15  ;;  %v161_v41 = vadd.s32 3, %v157_v40 }
  0xb7   :  { %v193_v17 = vmin.u32 %v134_v16, %v132_v15  ;;  %v162_v42 = vand.u32 3, %v161_v41 }
  0xb9   :  { %v136_v18 = vclz %v193_v17  ;;  %vm167_vm9 = vcmp.eq.s32.totalorder %v162_v42, 2  ;;  %vm164_vm10 = vcmp.eq.s32.totalorder %v162_v42, 0  ;;  %vm163_vm11 = vcmp.lt.s32.totalorder %v162_v42, 2 }
  0xbb   :  { %v194_v19 = vadd.s32 4294967294, %v136_v18 }
  0xbd   :  { %vm195_vm6 = vcmp.lt.s32.totalorder %v194_v19, 0 }
  0xbe   :  { %v139_v20 = vsel %vm195_vm6, 0, %v194_v19 }
  0xbf   :  { %v140_v23 = vsub.s32 32, %v139_v20  ;;  %v144_v24 = vsub.s32 4294967266, %v139_v20  ;;  %v141_v25 = vshll.u32 %v132_v15, %v139_v20 }
  0xc1   :  { %v142_v27 = vshrl.u32 %v124_v22, %v140_v23  ;;  %v145_v28 = vadd.s32 127, %v144_v24 }
  0xc3   :  { %v143_v29 = vor.u32 %v142_v27, %v141_v25  ;;  %v146_v30 = vshll.u32 %v145_v28, 23 }
  0xc5   :  { %v147_v31 = vor.u32 4788187, %v146_v30  ;;  %v150_v33 = vcvt.s32.f32 %v143_v29 }
  0xc7   :  { %v148_v32 = vand.u32 2147483647, %v147_v31 }
  0xc9   :  { %v151_v34 = vmul.f32 %v150_v33, %v148_v32 }
  0xcb   :  { %v152_v36 = vxor.u32 2147483648, %v151_v34 }
  0xcd   :  { %v153_v37 = vsel %vm70_vm7, %v152_v36, %v151_v34 }
  0xce   :  { %v156_v39 = vsel %vm69_vm8, %v293_v21, %v153_v37 }
  0xcf   :  { %216 = vcosq.f32 %v156_v39 }
  0xd0   :  { %218 = vsinq.f32 %v156_v39 }
  0xd9   :  { %v217_v43 = vpop.eup %216 }
  0xda   :  { %v219_v44 = vpop.eup %218  ;;  %v168_v45 = vxor.u32 2147483648, %v217_v43 }
  0xdb   :  { %v165_v46 = vxor.u32 2147483648, %v219_v44 }
  0xdc   :  { %v169_v47 = vsel %vm167_vm9, %v168_v45, %v219_v44 }
  0xdd   :  { %v166_v26 = vsel %vm164_vm10, %v217_v43, %v165_v46 }
  0xde   :  { %v170_v48 = vsel %vm163_vm11, %v166_v26, %v169_v47 }
  0xdf   :  { %v171_v49 = vsel %vm160_vm12, nan, %v170_v48 }
  0xe0   :  { %172 = vst [vmem:[#allocation2] sm:$0xff] %v171_v49 }
  0xe1   :  { %231 = shalt.err (!%p228_p4)
}
  0xe2   :  { %s232_s26 = scalar_lea.hbm %s329_s3, 128 }
  0xe3   :  { %p233_p5 = scmp.ne.s32.totalorder %s329_s3, %s232_s26  ;;  %p236_p6 = scmp.lt.u32.totalorder %s232_s26, %s329_s3 }
  0xe5   :  { %p238_p7 = pnand %p236_p6, %p233_p5 }
  0xe7   :  { %241 = shalt.err (!%p238_p7)
}
  0xe8   :  { %182 = dma.vmem_to_hbm [thread:$0]  %s180_s2, 128, %s329_s3, [#allocation3]  }
  0xe9   :  { %242 = dma.done.wait [#allocation3], 128  }
  0xea   :  { %243 = vsyncadd [#allocation3], 4294967168 }
  0xeb   :  { %186 = vsyncpa [#allocation3], 1 }

</bundles_post_ra>
